<compile_context>
chip_gen: v7x
topology: tpu7x:2x2x1
jax: 0.10.0
libtpu: 0.0.40
codegen_flags: <defaults>
</compile_context>

<pallas_src>
import jax
import jax.numpy as jnp
from jax.experimental import pallas as pl
from jax.experimental.pallas import tpu as pltpu

LANE = 128  # TPU vreg lane width


def _round_up(x, m):
    return (x + m - 1) // m * m


# ----------------------------- Pallas kernel --------------------------------

def _make_mlp_kernel(n_layers):
    """Fused n_layers-Linear MLP (ReLU between layers, none after the last).

    Kernel args: x_ref, (w1, b1, w2, b2, ..., wN, bN), o_ref
      x_ref : (tile_b, Kp)   bf16   activation tile (lane-dense)
      w_i   : (K_i, H_i)     bf16   VMEM-resident (constant index_map)
      b_i   : (1,  H_i)      f32    VMEM-resident
      o_ref : (tile_b, DoutP) f32
    """

    def kernel(x_ref, *refs):
        o_ref = refs[-1]
        h = x_ref[...]                                   # bf16 MXU operand
        out = None
        for i in range(n_layers):
            w = refs[2 * i][...]                         # bf16
            b = refs[2 * i + 1][...]                     # f32
            acc = jnp.dot(h, w, preferred_element_type=jnp.float32) + b
            if i < n_layers - 1:
                h = jnp.maximum(acc, 0.0).astype(jnp.bfloat16)   # f32 epilogue, bf16 next operand
            else:
                out = acc
        o_ref[...] = out.astype(o_ref.dtype)             # lane-dense 128-wide store

    return kernel


# ------------------------------ JAX glue -------------------------------------

def right_align_ids(user_hist, seqlen, max_seq_len):
    """Right-align the history ids (matches the PyTorch gather + padding logic)."""
    B, L = user_hist.shape
    assert L == max_seq_len
    idx = jnp.arange(L, dtype=jnp.int32)[None, :]                  # [1, L]
    idx = idx - (L - seqlen.astype(jnp.int32))[:, None]            # [B, L]
    padding_pos = idx < 0
    idx = jnp.where(padding_pos, 0, idx)
    reordered = jnp.take_along_axis(user_hist, idx, axis=-1)
    reordered = jnp.where(padding_pos, 0, reordered)               # padding -> item 0
    return reordered.astype(jnp.int32)


def mlp_query_encoder_forward(batch, item_emb_table, mlp_params, max_seq_len,
                              tile_b=256):
    user_hist = batch["in_item_id"]
    seqlen = batch["seqlen"]
    B, L = user_hist.shape
    D = item_emb_table.shape[1]
    n_layers = len(mlp_params)
    Dout = mlp_params[-1][0].shape[1]

    # ---- reorder + embedding lookup in XLA (one contiguous gather), bf16 operand ----
    ids = right_align_ids(user_hist, seqlen, max_seq_len)
    seq_embs = item_emb_table[ids].reshape(B, L * D).astype(jnp.bfloat16)

    # ---- batch tile: large (MXU-filling) but clamped to the actual batch ----
    tile_b = max(8, min(tile_b, _round_up(B, 8)))
    B_pad = _round_up(B, tile_b)
    Kp = _round_up(L * D, LANE)
    x_pad = jnp.zeros((B_pad, Kp), jnp.bfloat16).at[:B, :L * D].set(seq_embs)

    # ---- lane-pad weights (bf16 MXU operands) and biases (f32 epilogue) ----
    args = [x_pad]
    in_specs = [pl.BlockSpec((tile_b, Kp), lambda i: (i, 0))]
    prev_p = Kp
    for (w, b) in mlp_params:
        d_in, d_out = w.shape
        d_out_p = _round_up(d_out, LANE)
        w_p = (jnp.zeros((prev_p, d_out_p), jnp.bfloat16)
               .at[:d_in, :d_out].set(w.astype(jnp.bfloat16)))
        b_p = (jnp.zeros((1, d_out_p), jnp.float32)
               .at[:, :d_out].set(jnp.asarray(b, jnp.float32).reshape(1, -1)))
        args += [w_p, b_p]
        in_specs += [pl.BlockSpec((prev_p, d_out_p), lambda i: (0, 0)),   # VMEM-resident
                     pl.BlockSpec((1, d_out_p), lambda i: (0, 0))]
        prev_p = d_out_p
    DoutP = prev_p

    grid = (B_pad // tile_b,)
    kernel = _make_mlp_kernel(n_layers)

    out_pad = pl.pallas_call(
        kernel,
        out_shape=jax.ShapeDtypeStruct((B_pad, DoutP), jnp.float32),
        grid=grid,
        in_specs=in_specs,
        out_specs=pl.BlockSpec((tile_b, DoutP), lambda i: (i, 0)),
        compiler_params=pltpu.CompilerParams(
            dimension_semantics=("parallel",),        # batch tiles are independent
            vmem_limit_bytes=32 * 1024 * 1024,        # <1 MiB used; safe on v7x (64 MiB)
        ),
    )(*args)

    return out_pad[:B, :Dout]


# --------------------------- parameter init ----------------------------------

def xavier_normal(key, shape):
    fan_in, fan_out = shape[0], shape[1]
    std = (2.0 / (fan_in + fan_out)) ** 0.5
    return std * jax.random.normal(key, shape, dtype=jnp.float32)


def init_params(key, num_items, embed_dim, max_seq_len, hidden_layers):
    keys = jax.random.split(key, 8)
    emb = 0.02 * jax.random.normal(keys[0], (num_items, embed_dim), dtype=jnp.float32)
    emb = emb.at[0].set(0.0)  # padding_idx = 0

    dims = [embed_dim * max_seq_len] + hidden_layers + [embed_dim]
    mlp_params = []
    for i in range(len(dims) - 1):
        w = xavier_normal(keys[1 + i], (dims[i], dims[i + 1]))
        b = jnp.zeros((1, dims[i + 1]), dtype=jnp.float32)
        mlp_params.append((w, b))
    return emb, tuple(mlp_params)


# ------------------------------ references -----------------------------------

def reference_forward_f32(user_hist, seqlen, emb_table, mlp_params, max_seq_len):
    ids = right_align_ids(user_hist, seqlen, max_seq_len)
    h = emb_table[ids].reshape(user_hist.shape[0], -1)
    for i, (w, b) in enumerate(mlp_params):
        h = h @ w + b
        if i < len(mlp_params) - 1:
            h = jnp.maximum(h, 0.0)
    return h


def reference_forward_bf16(user_hist, seqlen, emb_table, mlp_params, max_seq_len):
    # Mirrors the kernel numerics: bf16 matmul operands, f32 accumulation / epilogue.
    ids = right_align_ids(user_hist, seqlen, max_seq_len)
    h = emb_table[ids].reshape(user_hist.shape[0], -1)
    for i, (w, b) in enumerate(mlp_params):
        h = jnp.dot(h.astype(jnp.bfloat16), w.astype(jnp.bfloat16),
                    preferred_element_type=jnp.float32) + b
        if i < len(mlp_params) - 1:
            h = jnp.maximum(h, 0.0)
    return h


# --------------------------------- main ---------------------------------------

if __name__ == "__main__":
    embed_dim = 32
    max_seq_len = 8
    hidden_layers = [64, 32]    # config['hidden_layers']
    num_items = 100
    batch_size = 2

    key = jax.random.PRNGKey(0)
    k_param, k_hist, k_len = jax.random.split(key, 3)

    item_emb_table, mlp_params = init_params(
        k_param, num_items, embed_dim, max_seq_len, hidden_layers)

    user_hist = jax.random.randint(
        k_hist, (batch_size, max_seq_len), 1, num_items, dtype=jnp.int32)
    seqlen = jax.random.randint(
        k_len, (batch_size,), 1, max_seq_len + 1, dtype=jnp.int32)
    pos = jnp.arange(max_seq_len)[None, :]
    user_hist = jnp.where(pos < seqlen[:, None], user_hist, 0)

    batch = {"in_item_id": user_hist, "seqlen": seqlen}

    out = mlp_query_encoder_forward(batch, item_emb_table, mlp_params, max_seq_len)
    out = jax.block_until_ready(out)

    assert out.shape == (batch_size, embed_dim)

    ref_mirror = reference_forward_bf16(
        user_hist, seqlen, item_emb_table, mlp_params, max_seq_len)
    ref_f32 = reference_forward_f32(
        user_hist, seqlen, item_emb_table, mlp_params, max_seq_len)

    # Tight check against the bf16-mirrored reference (same numerics as the kernel).
    assert jnp.allclose(out, ref_mirror, atol=1e-4, rtol=1e-2), \
        float(jnp.max(jnp.abs(out - ref_mirror)))
    # Loose sanity check against the pure f32 reference (bf16 operand rounding only).
    assert float(jnp.max(jnp.abs(out - ref_f32))) < 1e-2

    print("KERNEL_OK")
</pallas_src>

<mosaic_0001>
module attributes {stable_mosaic.version = 11 : i64} {
  func.func @kernel(%arg0: i32, %arg1: memref<8x256xbf16, #tpu.memory_space<vmem>>, %arg2: memref<256x128xbf16, #tpu.memory_space<vmem>>, %arg3: memref<1x128xf32, #tpu.memory_space<vmem>>, %arg4: memref<128x128xbf16, #tpu.memory_space<vmem>>, %arg5: memref<1x128xf32, #tpu.memory_space<vmem>>, %arg6: memref<128x128xbf16, #tpu.memory_space<vmem>>, %arg7: memref<1x128xf32, #tpu.memory_space<vmem>>, %arg8: memref<8x128xf32, #tpu.memory_space<vmem>>) attributes {dimension_semantics = [#tpu.dimension_semantics<parallel>], iteration_bounds = array<i64: 1>, scalar_prefetch = 0 : i64, scratch_operands = 0 : i64, tpu.core_type = #tpu.core_type<tc>, window_params = [{transform_indices = @transform_0, window_bounds = array<i64: 8, 256>}, {pipeline_mode = #tpu.pipeline_mode<synchronous>, transform_indices = @transform_1, window_bounds = array<i64: 256, 128>}, {pipeline_mode = #tpu.pipeline_mode<synchronous>, transform_indices = @transform_2, window_bounds = array<i64: 1, 128>}, {pipeline_mode = #tpu.pipeline_mode<synchronous>, transform_indices = @transform_3, window_bounds = array<i64: 128, 128>}, {pipeline_mode = #tpu.pipeline_mode<synchronous>, transform_indices = @transform_4, window_bounds = array<i64: 1, 128>}, {pipeline_mode = #tpu.pipeline_mode<synchronous>, transform_indices = @transform_5, window_bounds = array<i64: 128, 128>}, {pipeline_mode = #tpu.pipeline_mode<synchronous>, transform_indices = @transform_6, window_bounds = array<i64: 1, 128>}, {transform_indices = @transform_7, window_bounds = array<i64: 8, 128>}]} {
    %c0 = arith.constant 0 : index
    %c0_0 = arith.constant 0 : index
    %0 = vector.load %arg1[%c0, %c0_0] : memref<8x256xbf16, #tpu.memory_space<vmem>>, vector<8x256xbf16>
    %c0_1 = arith.constant 0 : index
    %c0_2 = arith.constant 0 : index
    %1 = vector.load %arg2[%c0_1, %c0_2] : memref<256x128xbf16, #tpu.memory_space<vmem>>, vector<256x128xbf16>
    %c0_3 = arith.constant 0 : index
    %c0_4 = arith.constant 0 : index
    %2 = vector.load %arg3[%c0_3, %c0_4] : memref<1x128xf32, #tpu.memory_space<vmem>>, vector<1x128xf32>
    %cst = arith.constant dense<0.000000e+00> : vector<8x128xf32>
    %3 = tpu.matmul %0, %1, %cst {dimension_numbers = #tpu.dot_dimension_numbers<[1], [0], [0], [1], [0, 0, 1, 1], [], []>} : vector<8x256xbf16>, vector<256x128xbf16>, vector<8x128xf32> -> vector<8x128xf32>
    %4 = vector.broadcast %2 : vector<1x128xf32> to vector<8x128xf32>
    %5 = arith.addf %3, %4 : vector<8x128xf32>
    %cst_5 = arith.constant 0.000000e+00 : f32
    %6 = vector.broadcast %cst_5 : f32 to vector<8x128xf32>
    %7 = arith.maximumf %5, %6 : vector<8x128xf32>
    %8 = arith.truncf %7 : vector<8x128xf32> to vector<8x128xbf16>
    %c0_6 = arith.constant 0 : index
    %c0_7 = arith.constant 0 : index
    %9 = vector.load %arg4[%c0_6, %c0_7] : memref<128x128xbf16, #tpu.memory_space<vmem>>, vector<128x128xbf16>
    %c0_8 = arith.constant 0 : index
    %c0_9 = arith.constant 0 : index
    %10 = vector.load %arg5[%c0_8, %c0_9] : memref<1x128xf32, #tpu.memory_space<vmem>>, vector<1x128xf32>
    %cst_10 = arith.constant dense<0.000000e+00> : vector<8x128xf32>
    %11 = tpu.matmul %8, %9, %cst_10 {dimension_numbers = #tpu.dot_dimension_numbers<[1], [0], [0], [1], [0, 0, 1, 1], [], []>} : vector<8x128xbf16>, vector<128x128xbf16>, vector<8x128xf32> -> vector<8x128xf32>
    %12 = vector.broadcast %10 : vector<1x128xf32> to vector<8x128xf32>
    %13 = arith.addf %11, %12 : vector<8x128xf32>
    %cst_11 = arith.constant 0.000000e+00 : f32
    %14 = vector.broadcast %cst_11 : f32 to vector<8x128xf32>
    %15 = arith.maximumf %13, %14 : vector<8x128xf32>
    %16 = arith.truncf %15 : vector<8x128xf32> to vector<8x128xbf16>
    %c0_12 = arith.constant 0 : index
    %c0_13 = arith.constant 0 : index
    %17 = vector.load %arg6[%c0_12, %c0_13] : memref<128x128xbf16, #tpu.memory_space<vmem>>, vector<128x128xbf16>
    %c0_14 = arith.constant 0 : index
    %c0_15 = arith.constant 0 : index
    %18 = vector.load %arg7[%c0_14, %c0_15] : memref<1x128xf32, #tpu.memory_space<vmem>>, vector<1x128xf32>
    %cst_16 = arith.constant dense<0.000000e+00> : vector<8x128xf32>
    %19 = tpu.matmul %16, %17, %cst_16 {dimension_numbers = #tpu.dot_dimension_numbers<[1], [0], [0], [1], [0, 0, 1, 1], [], []>} : vector<8x128xbf16>, vector<128x128xbf16>, vector<8x128xf32> -> vector<8x128xf32>
    %20 = vector.broadcast %18 : vector<1x128xf32> to vector<8x128xf32>
    %21 = arith.addf %19, %20 : vector<8x128xf32>
    %c0_17 = arith.constant 0 : index
    %c0_18 = arith.constant 0 : index
    %22 = vector.load %arg8[%c0_17, %c0_18] : memref<8x128xf32, #tpu.memory_space<vmem>>, vector<8x128xf32>
    tpu.vector_store %arg8[%c0_17, %c0_18], %21 {strides = array<i32>} : memref<8x128xf32, #tpu.memory_space<vmem>>, vector<8x128xf32>,
    return
  }
  func.func @transform_0(%arg0: i32) -> (i32, i32) {
    %c0_i32 = arith.constant 0 : i32
    %c0_i32_0 = arith.constant 0 : i32
    return %arg0, %c0_i32 : i32, i32
  }
  func.func @transform_1(%arg0: i32) -> (i32, i32) {
    %c0_i32 = arith.constant 0 : i32
    %c0_i32_0 = arith.constant 0 : i32
    %c0_i32_1 = arith.constant 0 : i32
    return %c0_i32, %c0_i32_0 : i32, i32
  }
  func.func @transform_2(%arg0: i32) -> (i32, i32) {
    %c0_i32 = arith.constant 0 : i32
    %c0_i32_0 = arith.constant 0 : i32
    %c0_i32_1 = arith.constant 0 : i32
    return %c0_i32, %c0_i32_0 : i32, i32
  }
  func.func @transform_3(%arg0: i32) -> (i32, i32) {
    %c0_i32 = arith.constant 0 : i32
    %c0_i32_0 = arith.constant 0 : i32
    %c0_i32_1 = arith.constant 0 : i32
    return %c0_i32, %c0_i32_0 : i32, i32
  }
  func.func @transform_4(%arg0: i32) -> (i32, i32) {
    %c0_i32 = arith.constant 0 : i32
    %c0_i32_0 = arith.constant 0 : i32
    %c0_i32_1 = arith.constant 0 : i32
    return %c0_i32, %c0_i32_0 : i32, i32
  }
  func.func @transform_5(%arg0: i32) -> (i32, i32) {
    %c0_i32 = arith.constant 0 : i32
    %c0_i32_0 = arith.constant 0 : i32
    %c0_i32_1 = arith.constant 0 : i32
    return %c0_i32, %c0_i32_0 : i32, i32
  }
  func.func @transform_6(%arg0: i32) -> (i32, i32) {
    %c0_i32 = arith.constant 0 : i32
    %c0_i32_0 = arith.constant 0 : i32
    %c0_i32_1 = arith.constant 0 : i32
    return %c0_i32, %c0_i32_0 : i32, i32
  }
  func.func @transform_7(%arg0: i32) -> (i32, i32) {
    %c0_i32 = arith.constant 0 : i32
    %c0_i32_0 = arith.constant 0 : i32
    return %arg0, %c0_i32 : i32, i32
  }
}

</mosaic_0001>

<bundles_post_ra>
// kernel: tpu_custom_call.1
= control target key start
LH: loop header
LB: loop body
LE: loop exit
PB: predicated region body
PF: predicated region fallthrough
CT: control target
= control target key end

     0   :  { %12 = vsyncpa [#allocation3], 0  ;;  %s931_s0 = inlined_call_operand.hbm [shape: bf16[8,256], index: 0, kind: input, shape index: {}]   ;;  %s932_s1 = inlined_call_operand.hbm [shape: bf16[256,128], index: 1, kind: input, shape index: {}]   ;;  %s933_s2 = inlined_call_operand.vmem [shape: f32[1,128], index: 2, kind: input, shape index: {}]   ;;  %s934_s3 = inlined_call_operand.hbm [shape: bf16[128,128], index: 3, kind: input, shape index: {}]   ;;  %s935_s4 = inlined_call_operand.vmem [shape: f32[1,128], index: 4, kind: input, shape index: {}]   ;;  %s936_s5 = inlined_call_operand.hbm [shape: bf16[128,128], index: 5, kind: input, shape index: {}]   ;;  %s937_s6 = inlined_call_operand.vmem [shape: f32[1,128], index: 6, kind: input, shape index: {}]   ;;  %s938_s7 = inlined_call_operand.hbm [shape: f32[8,128], index: 7, kind: output, shape index: {}]  }
   0x1   :  { %13 = vsyncpa [#allocation6], 0 }
   0x2   :  { %14 = vsyncpa [#allocation9], 0 }
   0x3   :  { %15 = vsyncpa [#allocation4], 0  ;;  %s786_s24 = smov [#allocation5]   ;;  %s668_s28 = scalar_lea.hbm %s932_s1, 2048 }
   0x4   :  { %s31_s25 = sshll.u32 %s786_s24, 4  ;;  %p669_p0 = scmp.ne.s32.totalorder %s932_s1, %s668_s28  ;;  %s32_s25 = int_to_ptr.vmem [resolvable:$true] %s31_s25 }
   0x5   :  { %p672_p1 = scmp.lt.u32.totalorder %s668_s28, %s932_s1 }
   0x7   :  { %p674_p2 = pnand %p672_p1, %p669_p0 }
   0x9   :  { %677 = shalt.err (!%p674_p2)
}
   0xa   :  { %s678_s10 = scalar_lea.vmem %s32_s25, 2048  ;;  %p683_p4 = scmp.lt.s32.totalorder %s32_s25, %s32_s25 }
   0xb   :  { %p679_p3 = scmp.ne.s32.totalorder %s32_s25, %s678_s10  ;;  %p684_p5 = scmp.lt.s32.totalorder %s678_s10, %s678_s10 }
   0xd   :  { %p685_p6 = por %p684_p5, %p683_p4 }
   0xf   :  { %p686_p7 = pnand %p685_p6, %p679_p3 }
  0x11   :  { %689 = shalt.err (!%p686_p7)
}
  0x12   :  { %s787_s11 = smov 64   ;;  %s788_s12 = smov 4  }
  0x13   :  { %37 = dma.hbm_to_vmem [thread:$0]  %s932_s1, 2048, %s32_s25, [#allocation6], %s787_s11, %s787_s11, %s788_s12  }
  0x14   :  { %s789_s15 = smov [#allocation2]   ;;  %s790_s17 = smov [#allocation7]  }
  0x15   :  { %s22_s16 = sshll.u32 %s789_s15, 4  ;;  %s45_s18 = sshll.u32 %s790_s17, 4  ;;  %s23_s16 = int_to_ptr.vmem [resolvable:$true] %s22_s16  ;;  %s46_s18 = int_to_ptr.vmem [resolvable:$true] %s45_s18 }
  0x16   :  { %s690_s21 = scalar_lea.hbm %s931_s0, 128 }
  0x17   :  { %p691_p8 = scmp.ne.s32.totalorder %s931_s0, %s690_s21  ;;  %p694_p9 = scmp.lt.u32.totalorder %s690_s21, %s931_s0 }
  0x19   :  { %p696_p10 = pnand %p694_p9, %p691_p8 }
  0x1b   :  { %699 = shalt.err (!%p696_p10)
}
  0x1c   :  { %s700_s1 = scalar_lea.vmem %s23_s16, 128  ;;  %p705_p12 = scmp.lt.s32.totalorder %s23_s16, %s23_s16 }
  0x1d   :  { %p701_p11 = scmp.ne.s32.totalorder %s23_s16, %s700_s1  ;;  %p706_p13 = scmp.lt.s32.totalorder %s700_s1, %s700_s1 }
  0x1f   :  { %p707_p0 = por %p706_p13, %p705_p12 }
  0x21   :  { %p708_p1 = pnand %p707_p0, %p701_p11 }
  0x23   :  { %711 = shalt.err (!%p708_p1)
}
  0x24   :  { %25 = dma.hbm_to_vmem [thread:$0]  %s931_s0, 128, %s23_s16, [#allocation3]  }
  0x25   :  { %s712_s30 = scalar_lea.hbm %s934_s3, 1024 }
  0x26   :  { %p713_p2 = scmp.ne.s32.totalorder %s934_s3, %s712_s30  ;;  %p716_p3 = scmp.lt.u32.totalorder %s712_s30, %s934_s3 }
  0x28   :  { %p718_p4 = pnand %p716_p3, %p713_p2 }
  0x2a   :  { %721 = shalt.err (!%p718_p4)
}
  0x2b   :  { %s722_s14 = scalar_lea.vmem %s46_s18, 1024  ;;  %p727_p6 = scmp.lt.s32.totalorder %s46_s18, %s46_s18 }
  0x2c   :  { %p723_p5 = scmp.ne.s32.totalorder %s46_s18, %s722_s14  ;;  %p728_p7 = scmp.lt.s32.totalorder %s722_s14, %s722_s14 }
  0x2e   :  { %p729_p8 = por %p728_p7, %p727_p6 }
  0x30   :  { %p730_p9 = pnand %p729_p8, %p723_p5 }
  0x32   :  { %733 = shalt.err (!%p730_p9)
}
  0x33   :  { %51 = dma.hbm_to_vmem [thread:$0]  %s934_s3, 1024, %s46_s18, [#allocation6], %s787_s11, %s787_s11, %s788_s12  }
  0x34   :  { %s791_s16 = smov [#allocation8]   ;;  %s734_s21 = scalar_lea.hbm %s936_s5, 1024 }
  0x35   :  { %s59_s17 = sshll.u32 %s791_s16, 4  ;;  %p735_p10 = scmp.ne.s32.totalorder %s936_s5, %s734_s21  ;;  %s60_s17 = int_to_ptr.vmem [resolvable:$true] %s59_s17 }
  0x36   :  { %p738_p11 = scmp.lt.u32.totalorder %s734_s21, %s936_s5 }
  0x38   :  { %p740_p12 = pnand %p738_p11, %p735_p10 }
  0x3a   :  { %743 = shalt.err (!%p740_p12)
}
  0x3b   :  { %s744_s1 = scalar_lea.vmem %s60_s17, 1024  ;;  %p749_p0 = scmp.lt.s32.totalorder %s60_s17, %s60_s17 }
  0x3c   :  { %p745_p13 = scmp.ne.s32.totalorder %s60_s17, %s744_s1  ;;  %p750_p1 = scmp.lt.s32.totalorder %s744_s1, %s744_s1 }
  0x3e   :  { %p751_p2 = por %p750_p1, %p749_p0 }
  0x40   :  { %p752_p3 = pnand %p751_p2, %p745_p13 }
  0x42   :  { %755 = shalt.err (!%p752_p3)
}
  0x43   :  { %65 = dma.hbm_to_vmem [thread:$0]  %s936_s5, 1024, %s60_s17, [#allocation9], %s787_s11, %s787_s11, %s788_s12  }
  0x44   :  { %778 = dma.done.wait [#allocation3], 128  }
  0x45   :  { %779 = vsyncadd [#allocation3], 4294967168 }
  0x46   :  { %780 = dma.done.wait [#allocation6], 3072  }
  0x47   :  { %781 = vsyncadd [#allocation6], 4294964224 }
  0x48   :  { %782 = dma.done.wait [#allocation9], 1024  }
  0x49   :  { %783 = vsyncadd [#allocation9], 4294966272  ;;  %v792_v0 = vmov 0.0   ;;  %v634_v1 = vld [vmem:[#allocation5 + $0x40] sm:$0xff]   ;;  %v636_v3 = vld [vmem:[#allocation5 + $0x48] sm:$0xff]   ;;  %vm793_vm0 = vmmov 0  }
  0x4a   :  { %585 = vmatprep.subr.bf16.mxu1 %v792_v0  ;;  %v635_v2 = vld [vmem:[#allocation5] sm:$0xff]   ;;  %545 = vmatprep.subr.bf16.mxu0 %v634_v1  ;;  %v637_v4 = vld [vmem:[#allocation5 + $0x8] sm:$0xff]   ;;  %v638_v5 = vld [vmem:[#allocation5 + $0x50] sm:$0xff]   ;;  %s794_s28 = smov [#allocation10]  }
  0x4b   :  { %546 = vmatpush3.bf16.msra.mxu0 %v635_v2  ;;  %v639_v6 = vld [vmem:[#allocation5 + $0x10] sm:$0xff]   ;;  %v640_v7 = vld [vmem:[#allocation5 + $0x58] sm:$0xff]   ;;  %v642_v9 = vld [vmem:[#allocation5 + $0x60] sm:$0xff]   ;;  %601 = vmatprep.mubr.msk.bf16.mxu1 %vm793_vm0, %v792_v0  ;;  %s497_s29 = sshll.u32 %s794_s28, 4  ;;  %s498_s29 = int_to_ptr.vmem [resolvable:$true] %s497_s29 }
  0x4c   :  { %547 = vmatprep.subr.bf16.mxu0 %v636_v3  ;;  %v641_v8 = vld [vmem:[#allocation5 + $0x18] sm:$0xff]   ;;  %v643_v10 = vld [vmem:[#allocation5 + $0x20] sm:$0xff]   ;;  %v644_v11 = vld [vmem:[#allocation5 + $0x68] sm:$0xff]   ;;  %p761_p5 = scmp.lt.s32.totalorder %s498_s29, %s498_s29 }
  0x4d   :  { %v81_v12 = vld [vmem:[#allocation2] sm:$0xff]  ;;  %v652_v14 = vld [vmem:[#allocation7] sm:$0xff]   ;;  %v645_v15 = vld [vmem:[#allocation5 + $0x28] sm:$0xff]  }
  0x4e   :  { %v510_v13 = vcombine.high %v81_v12, %v81_v12  ;;  %v646_v16 = vld [vmem:[#allocation5 + $0x70] sm:$0xff]   ;;  %586 = vmatpush3.bf16.msra.mxu1 %v652_v14  ;;  %v653_v17 = vld [vmem:[#allocation7 + $0x8] sm:$0xff]   ;;  %v648_v19 = vld [vmem:[#allocation5 + $0x78] sm:$0xff]   ;;  %v509_v23 = vcombine.low %v81_v12, %v81_v12 }
  0x4f   :  { %548 = vmatpush3.bf16.msra.mxu0 %v637_v4  ;;  %v647_v18 = vld [vmem:[#allocation5 + $0x30] sm:$0xff]   ;;  %587 = vmatprep.subr.bf16.mxu1 %v792_v0  ;;  %v649_v21 = vld [vmem:[#allocation5 + $0x38] sm:$0xff]   ;;  %v656_v24 = vld [vmem:[#allocation7 + $0x20] sm:$0xff]  }
  0x50   :  { %549 = vmatprep.subr.bf16.mxu0 %v638_v5  ;;  %256 = vmatprep.mubr.bf16.mxu0 %v510_v13  ;;  %v654_v20 = vld [vmem:[#allocation7 + $0x10] sm:$0xff]   ;;  %v655_v22 = vld [vmem:[#allocation7 + $0x18] sm:$0xff]   ;;  %v657_v25 = vld [vmem:[#allocation7 + $0x28] sm:$0xff]  }
  0x51   :  { %v658_v26 = vld [vmem:[#allocation7 + $0x30] sm:$0xff]   ;;  %v659_v27 = vld [vmem:[#allocation7 + $0x38] sm:$0xff]   ;;  %v660_v28 = vld [vmem:[#allocation8] sm:$0xff]  }
  0x52   :  { %588 = vmatpush3.bf16.msra.mxu1 %v653_v17  ;;  %v661_v29 = vld [vmem:[#allocation8 + $0x8] sm:$0xff]   ;;  %v662_v30 = vld [vmem:[#allocation8 + $0x10] sm:$0xff]   ;;  %v663_v31 = vld [vmem:[#allocation8 + $0x18] sm:$0xff]  }
  0x53   :  { %550 = vmatpush3.bf16.msra.mxu0 %v639_v6  ;;  %589 = vmatprep.subr.bf16.mxu1 %v792_v0  ;;  %v664_v32 = vld [vmem:[#allocation8 + $0x20] sm:$0xff]   ;;  %v665_v33 = vld [vmem:[#allocation8 + $0x28] sm:$0xff]   ;;  %v508_v35 = vld [vmem:[%s933_s2] ss:$0 sm:$0xff] }
  0x54   :  { %551 = vmatprep.subr.bf16.mxu0 %v640_v7  ;;  %v666_v43 = vld [vmem:[#allocation8 + $0x30] sm:$0xff]   ;;  %v667_v44 = vld [vmem:[#allocation8 + $0x38] sm:$0xff]  }
  0x55   :  { %v527_v45 = vld [vmem:[%s935_s4] ss:$0 sm:$0xff]  ;;  %s756_s4 = scalar_lea.vmem %s498_s29, 128 }
  0x56   :  { %590 = vmatpush3.bf16.msra.mxu1 %v654_v20  ;;  %v536_v53 = vld [vmem:[%s937_s6] ss:$0 sm:$0xff]  ;;  %p757_p4 = scmp.ne.s32.totalorder %s498_s29, %s756_s4  ;;  %p762_p6 = scmp.lt.s32.totalorder %s756_s4, %s756_s4 }
  0x57   :  { %552 = vmatpush3.bf16.msra.mxu0 %v641_v8  ;;  %591 = vmatprep.subr.bf16.mxu1 %v792_v0 }
  0x58   :  { %553 = vmatprep.subr.bf16.mxu0 %v642_v9  ;;  %p763_p7 = por %p762_p6, %p761_p5 }
  0x5a   :  { %592 = vmatpush3.bf16.msra.mxu1 %v655_v22  ;;  %p764_p8 = pnand %p763_p7, %p757_p4 }
  0x5b   :  { %554 = vmatpush3.bf16.msra.mxu0 %v643_v10  ;;  %593 = vmatprep.subr.bf16.mxu1 %v792_v0 }
  0x5c   :  { %555 = vmatprep.subr.bf16.mxu0 %v644_v11 }
  0x5e   :  { %594 = vmatpush3.bf16.msra.mxu1 %v656_v24 }
  0x5f   :  { %556 = vmatpush3.bf16.msra.mxu0 %v645_v15  ;;  %595 = vmatprep.subr.bf16.mxu1 %v792_v0 }
  0x60   :  { %557 = vmatprep.subr.bf16.mxu0 %v646_v16 }
  0x62   :  { %596 = vmatpush3.bf16.msra.mxu1 %v657_v25 }
  0x63   :  { %558 = vmatpush3.bf16.msra.mxu0 %v647_v18  ;;  %597 = vmatprep.subr.bf16.mxu1 %v792_v0 }
  0x64   :  { %559 = vmatprep.subr.bf16.mxu0 %v648_v19 }
  0x66   :  { %598 = vmatpush3.bf16.msra.mxu1 %v658_v26 }
  0x67   :  { %560 = vmatpush3.bf16.msra.mxu0 %v649_v21  ;;  %599 = vmatprep.subr.bf16.mxu1 %v792_v0 }
  0x68   :  { %605 = vmatprep.subr.bf16.mxu0 %v792_v0 }
  0x6a   :  { %257 = vmatmul.mubr.bf16.vlgmr.msra.gmra.mrb[0].mxu0 %v509_v23  ;;  %600 = vmatpush3.bf16.msra.mxu1 %v659_v27 }
  0x6b   :  { %621 = vmatprep.mubr.msk.bf16.mxu0 %vm793_vm0, %v792_v0  ;;  %606 = vmatpush3.bf16.msra.mxu0 %v660_v28 }
  0x6c   :  { %607 = vmatprep.subr.bf16.mxu0 %v792_v0 }
  0x6f   :  { %608 = vmatpush3.bf16.msra.mxu0 %v661_v29 }
  0x70   :  { %609 = vmatprep.subr.bf16.mxu0 %v792_v0 }
  0x73   :  { %610 = vmatpush3.bf16.msra.mxu0 %v662_v30 }
  0x74   :  { %611 = vmatprep.subr.bf16.mxu0 %v792_v0 }
  0x77   :  { %612 = vmatpush3.bf16.msra.mxu0 %v663_v31 }
  0x78   :  { %613 = vmatprep.subr.bf16.mxu0 %v792_v0 }
  0x7b   :  { %614 = vmatpush3.bf16.msra.mxu0 %v664_v32 }
  0x7c   :  { %615 = vmatprep.subr.bf16.mxu0 %v792_v0 }
  0x7f   :  { %616 = vmatpush3.bf16.msra.mxu0 %v665_v33 }
  0x80   :  { %617 = vmatprep.subr.bf16.mxu0 %v792_v0 }
  0x83   :  { %618 = vmatpush3.bf16.msra.mxu0 %v666_v43 }
  0x84   :  { %619 = vmatprep.subr.bf16.mxu0 %v792_v0 }
  0x87   :  { %620 = vmatpush3.bf16.msra.mxu0 %v667_v44 }
 0x13d   :  { %v561_v34 = vpop.f32.mrb[0].mxu0 }
 0x13e   :  { %v562_v36 = vpop.f32.mrb[1].mxu0 }
 0x13f   :  { %v563_v37 = vadd.f32 %v562_v36, %v561_v34  ;;  %v564_v38 = vpop.f32.mrb[2].mxu0 }
 0x140   :  { %v565_v39 = vpop.f32.mrb[3].mxu0 }
 0x141   :  { %v259_v40 = vadd.f32 %v563_v37, %v508_v35 }
 0x143   :  { %v264_v41 = vmax.f32 %v259_v40, 0.0 }
 0x145   :  { %v265_v42 = vpack.c.bf16 %v264_v41, %v264_v41 }
 0x147   :  { %602 = vmatmul.mubr.bf16.vlgmr.msra.gmra.mrb[0].mxu1 %v265_v42 }
 0x21a   :  { %v371_v46 = vpop.f32.mrb[0].mxu1 }
 0x21b   :  { %v372_v47 = vadd.f32 %v527_v45, %v371_v46  ;;  %v603_v48 = vpop.f32.mrb[1].mxu1 }
 0x21c   :  { %v374_v49 = vpop.f32.mrb[2].mxu1 }
 0x21d   :  { %v377_v50 = vmax.f32 %v372_v47, 0.0  ;;  %v604_v51 = vpop.f32.mrb[3].mxu1 }
 0x21f   :  { %v378_v52 = vpack.c.bf16 %v377_v50, %v377_v50 }
 0x221   :  { %622 = vmatmul.mubr.bf16.vlgmr.msra.gmra.mrb[4].mxu0 %v378_v52 }
 0x2f4   :  { %v484_v54 = vpop.f32.mrb[4].mxu0 }
 0x2f5   :  { %v485_v55 = vadd.f32 %v536_v53, %v484_v54  ;;  %v623_v56 = vpop.f32.mrb[5].mxu0 }
 0x2f6   :  { %v487_v57 = vpop.f32.mrb[6].mxu0 }
 0x2f7   :  { %490 = vst [vmem:[#allocation10] sm:$0xff] %v485_v55  ;;  %v624_v58 = vpop.f32.mrb[7].mxu0 }
 0x2f8   :  { %767 = shalt.err (!%p764_p8)
}
 0x2f9   :  { %s768_s6 = scalar_lea.hbm %s938_s7, 128 }
 0x2fa   :  { %p769_p9 = scmp.ne.s32.totalorder %s938_s7, %s768_s6  ;;  %p772_p10 = scmp.lt.u32.totalorder %s768_s6, %s938_s7 }
 0x2fc   :  { %p774_p11 = pnand %p772_p10, %p769_p9 }
 0x2fe   :  { %777 = shalt.err (!%p774_p11)
}
 0x2ff   :  { %500 = dma.vmem_to_hbm [thread:$0]  %s498_s29, 128, %s938_s7, [#allocation4]  }
 0x300   :  { %784 = dma.done.wait [#allocation4], 128  }
 0x301   :  { %785 = vsyncadd [#allocation4], 4294967168 }
 0x302   :  { %504 = vsyncpa [#allocation3], 1 }
 0x303   :  { %505 = vsyncpa [#allocation6], 1 }
 0x304   :  { %506 = vsyncpa [#allocation9], 1 }
 0x305   :  { %507 = vsyncpa [#allocation4], 1 }

</bundles_post_ra>
